<compile_context>
chip_gen: v5e
topology: v5e:2x2
jax: 0.10.0
libtpu: 0.0.40
codegen_flags: <defaults>
</compile_context>

<pallas_src>
import functools

import jax
import jax.numpy as jnp
from jax import lax
from jax.experimental import pallas as pl
from jax.experimental.pallas import tpu as pltpu


def _attention2_kernel(xcat_ref, w_ref, bo_ref, o_ref, *,
                       bb, n, m, heads, d, scale):
    # xcat_ref: (bb*(N+M), D) -- per batch: N query rows, then M key/value rows
    # w_ref:    (D, 4*D)      -- [Wq | Wk | Wv | Wo] packed along lanes
    # bo_ref:   (1, D)        -- to_out bias
    # o_ref:    (bb*N, D)
    xcat = xcat_ref[...]
    w = w_ref[...]
    bo = bo_ref[...].astype(jnp.float32)                    # (1, D)

    dh = d // heads
    t = n + m                                               # stacked rows per batch

    # One fused projection matmul for q, k, v of every batch in this block.
    # Columns [3D, 4D) of the product are unused (Wo is only *read* below), but
    # the extra columns make the weight tile exactly 128 lanes wide and the
    # wasted flops are free at this MXU occupancy (K = 32 contraction).
    proj = jnp.dot(xcat, w, preferred_element_type=jnp.float32)   # (bb*T, 4D)
    wo = w[:, 3 * d:4 * d]                                        # (D, D)

    dn_qk = (((1,), (1,)), ((), ()))   # contract last dims -> K fed untransposed

    # ---- scores for every (batch, head), stacked along sublanes -------------
    dots_tiles = []
    for b in range(bb):                                    # static, unrolled
        # Fold the softmax scale into q once per batch (not per head / score).
        q_b = proj[b * t:b * t + n, 0 * d:1 * d] * scale   # (N, D)
        k_b = proj[b * t + n:(b + 1) * t, 1 * d:2 * d]     # (M, D)
        for h in range(heads):                             # static, unrolled
            qh = q_b[:, h * dh:(h + 1) * dh]               # (N, dh)
            kh = k_b[:, h * dh:(h + 1) * dh]               # (M, dh)
            dots_tiles.append(
                lax.dot_general(qh, kh, dn_qk,
                                preferred_element_type=jnp.float32))  # (N, M)
    dots = jnp.concatenate(dots_tiles, axis=0)             # (bb*H*N, M)

    # ---- one fused, numerically-stable softmax over all score tiles ---------
    mx = jnp.max(dots, axis=-1, keepdims=True)
    e = jnp.exp(dots - mx)
    denom = jnp.sum(e, axis=-1, keepdims=True)
    attn = e / denom                                       # exact reciprocal

    # ---- attn @ v per (batch, head); lane-assemble; ONE Wo matmul ------------
    row_groups = []
    for b in range(bb):
        v_b = proj[b * t + n:(b + 1) * t, 2 * d:3 * d]     # (M, D)
        head_outs = []
        for h in range(heads):
            idx = b * heads + h
            a_bh = attn[idx * n:(idx + 1) * n, :]          # (N, M)
            vh = v_b[:, h * dh:(h + 1) * dh]               # (M, dh)
            head_outs.append(
                jnp.dot(a_bh, vh, preferred_element_type=jnp.float32))  # (N, dh)
        row_groups.append(jnp.concatenate(head_outs, axis=-1))          # (N, D)
    ctx = jnp.concatenate(row_groups, axis=0)              # (bb*N, D)

    out = jnp.dot(ctx, wo, preferred_element_type=jnp.float32) + bo
    o_ref[...] = out.astype(o_ref.dtype)                   # single full-tile store


def _num_batch_blocks(batch):
    """Use 2 grid blocks (one per TensorCore) on v7x; 1 on v5e/v6e (single TC)."""
    try:
        kind = jax.devices()[0].device_kind.lower()
    except Exception:
        return 1
    if "v7" in kind and batch % 2 == 0:
        return 2
    return 1


def attention2_pallas(x, x2, wq, wk, wv, wo, bo, *, heads, scale,
                      batch_blocks=None):
    """x: (B, N, D) queries, x2: (B, M, D) keys/values. Returns (B, N, D)."""
    b, n, d = x.shape
    _, m, _ = x2.shape
    assert d % heads == 0, "dim must be divisible by heads"

    nb = _num_batch_blocks(b) if batch_blocks is None else batch_blocks
    assert b % nb == 0
    bb = b // nb
    t = n + m

    # Per-batch row-stack [x_b ; x2_b] so one fused MXU matmul projects q/k/v
    # for the whole grid block, and each block is a contiguous row range.
    xcat = jnp.concatenate([x, x2], axis=1).reshape(b * t, d)
    # Pack [Wq | Wk | Wv | Wo] into a single lane-dense (D, 4D) = (32, 128) tile.
    w_packed = jnp.concatenate([wq, wk, wv, wo], axis=1)
    bo2 = bo.reshape(1, d)

    kernel = functools.partial(_attention2_kernel, bb=bb, n=n, m=m,
                               heads=heads, d=d, scale=scale)

    out_flat = pl.pallas_call(
        kernel,
        out_shape=jax.ShapeDtypeStruct((b * n, d), x.dtype),
        grid=(nb,),
        in_specs=[
            pl.BlockSpec((bb * t, d), lambda i: (i, 0)),     # [x_b; x2_b] rows
            pl.BlockSpec((d, 4 * d), lambda i: (0, 0)),      # Wq|Wk|Wv|Wo packed
            pl.BlockSpec((1, d), lambda i: (0, 0)),          # to_out bias
        ],
        out_specs=pl.BlockSpec((bb * n, d), lambda i: (i, 0)),
        compiler_params=pltpu.CompilerParams(
            dimension_semantics=("parallel",)),
    )(xcat, w_packed, bo2)

    return out_flat.reshape(b, n, d)


def attention2_ref(x, x2, wq, wk, wv, wo, bo, *, heads, scale):
    """Plain-JAX reference mirroring the PyTorch forward (mask=None)."""
    b, n, d = x.shape
    m = x2.shape[1]
    dh = d // heads
    q = (x @ wq).reshape(b, n, heads, dh).transpose(0, 2, 1, 3)
    k = (x2 @ wk).reshape(b, m, heads, dh).transpose(0, 2, 1, 3)
    v = (x2 @ wv).reshape(b, m, heads, dh).transpose(0, 2, 1, 3)
    dots = jnp.einsum('bhid,bhjd->bhij', q, k) * scale
    attn = jax.nn.softmax(dots, axis=-1)
    out = jnp.einsum('bhij,bhjd->bhid', attn, v)
    out = out.transpose(0, 2, 1, 3).reshape(b, n, d)
    return out @ wo + bo


if __name__ == "__main__":
    # Small shapes consistent with the module's forward.
    B, N, M = 2, 8, 16          # batch, query tokens, key/value tokens
    DIM, HEADS = 32, 4          # hidden dim, heads (head_dim = 8)
    SCALE = DIM ** (-0.5)       # scale_with_head=False (default)

    key = jax.random.PRNGKey(0)
    kx, kx2, kq, kk, kv, ko, kb = jax.random.split(key, 7)

    x = jax.random.normal(kx, (B, N, DIM), dtype=jnp.float32)
    x2 = jax.random.normal(kx2, (B, M, DIM), dtype=jnp.float32)

    # Parameters already in (in, out) layout, i.e. y = x @ W matches
    # PyTorch's nn.Linear(x) = x @ W_pt.T.
    s = 0.05
    wq = s * jax.random.normal(kq, (DIM, DIM), dtype=jnp.float32)
    wk = s * jax.random.normal(kk, (DIM, DIM), dtype=jnp.float32)
    wv = s * jax.random.normal(kv, (DIM, DIM), dtype=jnp.float32)
    wo = s * jax.random.normal(ko, (DIM, DIM), dtype=jnp.float32)
    bo = s * jax.random.normal(kb, (DIM,), dtype=jnp.float32)

    out = attention2_pallas(x, x2, wq, wk, wv, wo, bo, heads=HEADS, scale=SCALE)
    out = jax.block_until_ready(out)

    ref = attention2_ref(x, x2, wq, wk, wv, wo, bo, heads=HEADS, scale=SCALE)
    assert out.shape == (B, N, DIM)
    assert jnp.allclose(out, ref, atol=1e-4, rtol=1e-4), "mismatch vs reference"

    print("KERNEL_OK")
</pallas_src>

<mosaic_0001>
module attributes {stable_mosaic.version = 11 : i64} {
  func.func @_attention2_kernel(%arg0: i32, %arg1: memref<48x32xf32, #tpu.memory_space<vmem>>, %arg2: memref<32x128xf32, #tpu.memory_space<vmem>>, %arg3: memref<1x32xf32, #tpu.memory_space<vmem>>, %arg4: memref<16x32xf32, #tpu.memory_space<vmem>>) attributes {dimension_semantics = [#tpu.dimension_semantics<parallel>], iteration_bounds = array<i64: 1>, scalar_prefetch = 0 : i64, scratch_operands = 0 : i64, tpu.core_type = #tpu.core_type<tc>, window_params = [{transform_indices = @transform_0, window_bounds = array<i64: 48, 32>}, {pipeline_mode = #tpu.pipeline_mode<synchronous>, transform_indices = @transform_1, window_bounds = array<i64: 32, 128>}, {pipeline_mode = #tpu.pipeline_mode<synchronous>, transform_indices = @transform_2, window_bounds = array<i64: 1, 32>}, {transform_indices = @transform_3, window_bounds = array<i64: 16, 32>}]} {
    %c0 = arith.constant 0 : index
    %c0_0 = arith.constant 0 : index
    %0 = vector.load %arg1[%c0, %c0_0] : memref<48x32xf32, #tpu.memory_space<vmem>>, vector<48x32xf32>
    %c0_1 = arith.constant 0 : index
    %c0_2 = arith.constant 0 : index
    %1 = vector.load %arg2[%c0_1, %c0_2] : memref<32x128xf32, #tpu.memory_space<vmem>>, vector<32x128xf32>
    %c0_3 = arith.constant 0 : index
    %c0_4 = arith.constant 0 : index
    %2 = vector.load %arg3[%c0_3, %c0_4] : memref<1x32xf32, #tpu.memory_space<vmem>>, vector<1x32xf32>
    %cst = arith.constant dense<0.000000e+00> : vector<48x128xf32>
    %3 = tpu.matmul %0, %1, %cst {dimension_numbers = #tpu.dot_dimension_numbers<[1], [0], [0], [1], [0, 0, 1, 1], [], []>} : vector<48x32xf32>, vector<32x128xf32>, vector<48x128xf32> -> vector<48x128xf32>
    %4 = vector.extract_strided_slice %1 {offsets = [0, 96], sizes = [32, 32], strides = [1, 1]} : vector<32x128xf32> to vector<32x32xf32>
    %5 = vector.extract_strided_slice %3 {offsets = [0, 0], sizes = [8, 32], strides = [1, 1]} : vector<48x128xf32> to vector<8x32xf32>
    %cst_5 = arith.constant 0.176776692 : f32
    %6 = vector.broadcast %cst_5 : f32 to vector<8x32xf32>
    %7 = arith.mulf %5, %6 : vector<8x32xf32>
    %8 = vector.extract_strided_slice %3 {offsets = [8, 32], sizes = [16, 32], strides = [1, 1]} : vector<48x128xf32> to vector<16x32xf32>
    %9 = vector.extract_strided_slice %7 {offsets = [0, 0], sizes = [8, 8], strides = [1, 1]} : vector<8x32xf32> to vector<8x8xf32>
    %10 = vector.extract_strided_slice %8 {offsets = [0, 0], sizes = [16, 8], strides = [1, 1]} : vector<16x32xf32> to vector<16x8xf32>
    %cst_6 = arith.constant dense<0.000000e+00> : vector<8x16xf32>
    %11 = tpu.matmul %9, %10, %cst_6 {dimension_numbers = #tpu.dot_dimension_numbers<[1], [1], [0], [0], [0, 0, 1, 0], [], []>} : vector<8x8xf32>, vector<16x8xf32>, vector<8x16xf32> -> vector<8x16xf32>
    %12 = vector.extract_strided_slice %7 {offsets = [0, 8], sizes = [8, 8], strides = [1, 1]} : vector<8x32xf32> to vector<8x8xf32>
    %13 = vector.extract_strided_slice %8 {offsets = [0, 8], sizes = [16, 8], strides = [1, 1]} : vector<16x32xf32> to vector<16x8xf32>
    %cst_7 = arith.constant dense<0.000000e+00> : vector<8x16xf32>
    %14 = tpu.matmul %12, %13, %cst_7 {dimension_numbers = #tpu.dot_dimension_numbers<[1], [1], [0], [0], [0, 0, 1, 0], [], []>} : vector<8x8xf32>, vector<16x8xf32>, vector<8x16xf32> -> vector<8x16xf32>
    %15 = vector.extract_strided_slice %7 {offsets = [0, 16], sizes = [8, 8], strides = [1, 1]} : vector<8x32xf32> to vector<8x8xf32>
    %16 = vector.extract_strided_slice %8 {offsets = [0, 16], sizes = [16, 8], strides = [1, 1]} : vector<16x32xf32> to vector<16x8xf32>
    %cst_8 = arith.constant dense<0.000000e+00> : vector<8x16xf32>
    %17 = tpu.matmul %15, %16, %cst_8 {dimension_numbers = #tpu.dot_dimension_numbers<[1], [1], [0], [0], [0, 0, 1, 0], [], []>} : vector<8x8xf32>, vector<16x8xf32>, vector<8x16xf32> -> vector<8x16xf32>
    %18 = vector.extract_strided_slice %7 {offsets = [0, 24], sizes = [8, 8], strides = [1, 1]} : vector<8x32xf32> to vector<8x8xf32>
    %19 = vector.extract_strided_slice %8 {offsets = [0, 24], sizes = [16, 8], strides = [1, 1]} : vector<16x32xf32> to vector<16x8xf32>
    %cst_9 = arith.constant dense<0.000000e+00> : vector<8x16xf32>
    %20 = tpu.matmul %18, %19, %cst_9 {dimension_numbers = #tpu.dot_dimension_numbers<[1], [1], [0], [0], [0, 0, 1, 0], [], []>} : vector<8x8xf32>, vector<16x8xf32>, vector<8x16xf32> -> vector<8x16xf32>
    %21 = vector.extract_strided_slice %3 {offsets = [24, 0], sizes = [8, 32], strides = [1, 1]} : vector<48x128xf32> to vector<8x32xf32>
    %cst_10 = arith.constant 0.176776692 : f32
    %22 = vector.broadcast %cst_10 : f32 to vector<8x32xf32>
    %23 = arith.mulf %21, %22 : vector<8x32xf32>
    %24 = vector.extract_strided_slice %3 {offsets = [32, 32], sizes = [16, 32], strides = [1, 1]} : vector<48x128xf32> to vector<16x32xf32>
    %25 = vector.extract_strided_slice %23 {offsets = [0, 0], sizes = [8, 8], strides = [1, 1]} : vector<8x32xf32> to vector<8x8xf32>
    %26 = vector.extract_strided_slice %24 {offsets = [0, 0], sizes = [16, 8], strides = [1, 1]} : vector<16x32xf32> to vector<16x8xf32>
    %cst_11 = arith.constant dense<0.000000e+00> : vector<8x16xf32>
    %27 = tpu.matmul %25, %26, %cst_11 {dimension_numbers = #tpu.dot_dimension_numbers<[1], [1], [0], [0], [0, 0, 1, 0], [], []>} : vector<8x8xf32>, vector<16x8xf32>, vector<8x16xf32> -> vector<8x16xf32>
    %28 = vector.extract_strided_slice %23 {offsets = [0, 8], sizes = [8, 8], strides = [1, 1]} : vector<8x32xf32> to vector<8x8xf32>
    %29 = vector.extract_strided_slice %24 {offsets = [0, 8], sizes = [16, 8], strides = [1, 1]} : vector<16x32xf32> to vector<16x8xf32>
    %cst_12 = arith.constant dense<0.000000e+00> : vector<8x16xf32>
    %30 = tpu.matmul %28, %29, %cst_12 {dimension_numbers = #tpu.dot_dimension_numbers<[1], [1], [0], [0], [0, 0, 1, 0], [], []>} : vector<8x8xf32>, vector<16x8xf32>, vector<8x16xf32> -> vector<8x16xf32>
    %31 = vector.extract_strided_slice %23 {offsets = [0, 16], sizes = [8, 8], strides = [1, 1]} : vector<8x32xf32> to vector<8x8xf32>
    %32 = vector.extract_strided_slice %24 {offsets = [0, 16], sizes = [16, 8], strides = [1, 1]} : vector<16x32xf32> to vector<16x8xf32>
    %cst_13 = arith.constant dense<0.000000e+00> : vector<8x16xf32>
    %33 = tpu.matmul %31, %32, %cst_13 {dimension_numbers = #tpu.dot_dimension_numbers<[1], [1], [0], [0], [0, 0, 1, 0], [], []>} : vector<8x8xf32>, vector<16x8xf32>, vector<8x16xf32> -> vector<8x16xf32>
    %34 = vector.extract_strided_slice %23 {offsets = [0, 24], sizes = [8, 8], strides = [1, 1]} : vector<8x32xf32> to vector<8x8xf32>
    %35 = vector.extract_strided_slice %24 {offsets = [0, 24], sizes = [16, 8], strides = [1, 1]} : vector<16x32xf32> to vector<16x8xf32>
    %cst_14 = arith.constant dense<0.000000e+00> : vector<8x16xf32>
    %36 = tpu.matmul %34, %35, %cst_14 {dimension_numbers = #tpu.dot_dimension_numbers<[1], [1], [0], [0], [0, 0, 1, 0], [], []>} : vector<8x8xf32>, vector<16x8xf32>, vector<8x16xf32> -> vector<8x16xf32>
    %37 = tpu.concatenate %11, %14, %17, %20, %27, %30, %33, %36 in 0 : vector<8x16xf32>, vector<8x16xf32>, vector<8x16xf32>, vector<8x16xf32>, vector<8x16xf32>, vector<8x16xf32>, vector<8x16xf32>, vector<8x16xf32> -> vector<64x16xf32>
    %cst_15 = arith.constant dense<0xFF800000> : vector<64xf32>
    %38 = vector.multi_reduction <maximumf>, %37, %cst_15 [1] : vector<64x16xf32> to vector<64xf32>
    %39 = vector.shape_cast %38 : vector<64xf32> to vector<64x1xf32>
    %40 = vector.broadcast %39 : vector<64x1xf32> to vector<64x16xf32>
    %41 = arith.subf %37, %40 : vector<64x16xf32>
    %42 = math.exp %41 : vector<64x16xf32>
    %cst_16 = arith.constant dense<0.000000e+00> : vector<64xf32>
    %43 = vector.multi_reduction <add>, %42, %cst_16 [1] : vector<64x16xf32> to vector<64xf32>
    %44 = vector.shape_cast %43 : vector<64xf32> to vector<64x1xf32>
    %45 = vector.broadcast %44 : vector<64x1xf32> to vector<64x16xf32>
    %46 = arith.divf %42, %45 : vector<64x16xf32>
    %47 = vector.extract_strided_slice %3 {offsets = [8, 64], sizes = [16, 32], strides = [1, 1]} : vector<48x128xf32> to vector<16x32xf32>
    %48 = vector.extract_strided_slice %46 {offsets = [0, 0], sizes = [8, 16], strides = [1, 1]} : vector<64x16xf32> to vector<8x16xf32>
    %49 = vector.extract_strided_slice %47 {offsets = [0, 0], sizes = [16, 8], strides = [1, 1]} : vector<16x32xf32> to vector<16x8xf32>
    %cst_17 = arith.constant dense<0.000000e+00> : vector<8x8xf32>
    %50 = tpu.matmul %48, %49, %cst_17 {dimension_numbers = #tpu.dot_dimension_numbers<[1], [0], [0], [1], [0, 0, 1, 1], [], []>} : vector<8x16xf32>, vector<16x8xf32>, vector<8x8xf32> -> vector<8x8xf32>
    %51 = vector.extract_strided_slice %46 {offsets = [8, 0], sizes = [8, 16], strides = [1, 1]} : vector<64x16xf32> to vector<8x16xf32>
    %52 = vector.extract_strided_slice %47 {offsets = [0, 8], sizes = [16, 8], strides = [1, 1]} : vector<16x32xf32> to vector<16x8xf32>
    %cst_18 = arith.constant dense<0.000000e+00> : vector<8x8xf32>
    %53 = tpu.matmul %51, %52, %cst_18 {dimension_numbers = #tpu.dot_dimension_numbers<[1], [0], [0], [1], [0, 0, 1, 1], [], []>} : vector<8x16xf32>, vector<16x8xf32>, vector<8x8xf32> -> vector<8x8xf32>
    %54 = vector.extract_strided_slice %46 {offsets = [16, 0], sizes = [8, 16], strides = [1, 1]} : vector<64x16xf32> to vector<8x16xf32>
    %55 = vector.extract_strided_slice %47 {offsets = [0, 16], sizes = [16, 8], strides = [1, 1]} : vector<16x32xf32> to vector<16x8xf32>
    %cst_19 = arith.constant dense<0.000000e+00> : vector<8x8xf32>
    %56 = tpu.matmul %54, %55, %cst_19 {dimension_numbers = #tpu.dot_dimension_numbers<[1], [0], [0], [1], [0, 0, 1, 1], [], []>} : vector<8x16xf32>, vector<16x8xf32>, vector<8x8xf32> -> vector<8x8xf32>
    %57 = vector.extract_strided_slice %46 {offsets = [24, 0], sizes = [8, 16], strides = [1, 1]} : vector<64x16xf32> to vector<8x16xf32>
    %58 = vector.extract_strided_slice %47 {offsets = [0, 24], sizes = [16, 8], strides = [1, 1]} : vector<16x32xf32> to vector<16x8xf32>
    %cst_20 = arith.constant dense<0.000000e+00> : vector<8x8xf32>
    %59 = tpu.matmul %57, %58, %cst_20 {dimension_numbers = #tpu.dot_dimension_numbers<[1], [0], [0], [1], [0, 0, 1, 1], [], []>} : vector<8x16xf32>, vector<16x8xf32>, vector<8x8xf32> -> vector<8x8xf32>
    %60 = tpu.concatenate %50, %53, %56, %59 in 1 : vector<8x8xf32>, vector<8x8xf32>, vector<8x8xf32>, vector<8x8xf32> -> vector<8x32xf32>
    %61 = vector.extract_strided_slice %3 {offsets = [32, 64], sizes = [16, 32], strides = [1, 1]} : vector<48x128xf32> to vector<16x32xf32>
    %62 = vector.extract_strided_slice %46 {offsets = [32, 0], sizes = [8, 16], strides = [1, 1]} : vector<64x16xf32> to vector<8x16xf32>
    %63 = vector.extract_strided_slice %61 {offsets = [0, 0], sizes = [16, 8], strides = [1, 1]} : vector<16x32xf32> to vector<16x8xf32>
    %cst_21 = arith.constant dense<0.000000e+00> : vector<8x8xf32>
    %64 = tpu.matmul %62, %63, %cst_21 {dimension_numbers = #tpu.dot_dimension_numbers<[1], [0], [0], [1], [0, 0, 1, 1], [], []>} : vector<8x16xf32>, vector<16x8xf32>, vector<8x8xf32> -> vector<8x8xf32>
    %65 = vector.extract_strided_slice %46 {offsets = [40, 0], sizes = [8, 16], strides = [1, 1]} : vector<64x16xf32> to vector<8x16xf32>
    %66 = vector.extract_strided_slice %61 {offsets = [0, 8], sizes = [16, 8], strides = [1, 1]} : vector<16x32xf32> to vector<16x8xf32>
    %cst_22 = arith.constant dense<0.000000e+00> : vector<8x8xf32>
    %67 = tpu.matmul %65, %66, %cst_22 {dimension_numbers = #tpu.dot_dimension_numbers<[1], [0], [0], [1], [0, 0, 1, 1], [], []>} : vector<8x16xf32>, vector<16x8xf32>, vector<8x8xf32> -> vector<8x8xf32>
    %68 = vector.extract_strided_slice %46 {offsets = [48, 0], sizes = [8, 16], strides = [1, 1]} : vector<64x16xf32> to vector<8x16xf32>
    %69 = vector.extract_strided_slice %61 {offsets = [0, 16], sizes = [16, 8], strides = [1, 1]} : vector<16x32xf32> to vector<16x8xf32>
    %cst_23 = arith.constant dense<0.000000e+00> : vector<8x8xf32>
    %70 = tpu.matmul %68, %69, %cst_23 {dimension_numbers = #tpu.dot_dimension_numbers<[1], [0], [0], [1], [0, 0, 1, 1], [], []>} : vector<8x16xf32>, vector<16x8xf32>, vector<8x8xf32> -> vector<8x8xf32>
    %71 = vector.extract_strided_slice %46 {offsets = [56, 0], sizes = [8, 16], strides = [1, 1]} : vector<64x16xf32> to vector<8x16xf32>
    %72 = vector.extract_strided_slice %61 {offsets = [0, 24], sizes = [16, 8], strides = [1, 1]} : vector<16x32xf32> to vector<16x8xf32>
    %cst_24 = arith.constant dense<0.000000e+00> : vector<8x8xf32>
    %73 = tpu.matmul %71, %72, %cst_24 {dimension_numbers = #tpu.dot_dimension_numbers<[1], [0], [0], [1], [0, 0, 1, 1], [], []>} : vector<8x16xf32>, vector<16x8xf32>, vector<8x8xf32> -> vector<8x8xf32>
    %74 = tpu.concatenate %64, %67, %70, %73 in 1 : vector<8x8xf32>, vector<8x8xf32>, vector<8x8xf32>, vector<8x8xf32> -> vector<8x32xf32>
    %75 = tpu.concatenate %60, %74 in 0 : vector<8x32xf32>, vector<8x32xf32> -> vector<16x32xf32>
    %cst_25 = arith.constant dense<0.000000e+00> : vector<16x32xf32>
    %76 = tpu.matmul %75, %4, %cst_25 {dimension_numbers = #tpu.dot_dimension_numbers<[1], [0], [0], [1], [0, 0, 1, 1], [], []>} : vector<16x32xf32>, vector<32x32xf32>, vector<16x32xf32> -> vector<16x32xf32>
    %77 = vector.broadcast %2 : vector<1x32xf32> to vector<16x32xf32>
    %78 = arith.addf %76, %77 : vector<16x32xf32>
    %c0_26 = arith.constant 0 : index
    %c0_27 = arith.constant 0 : index
    %79 = vector.load %arg4[%c0_26, %c0_27] : memref<16x32xf32, #tpu.memory_space<vmem>>, vector<16x32xf32>
    tpu.vector_store %arg4[%c0_26, %c0_27], %78 {strides = array<i32>} : memref<16x32xf32, #tpu.memory_space<vmem>>, vector<16x32xf32>,
    return
  }
  func.func @transform_0(%arg0: i32) -> (i32, i32) {
    %c0_i32 = arith.constant 0 : i32
    %c0_i32_0 = arith.constant 0 : i32
    return %arg0, %c0_i32 : i32, i32
  }
  func.func @transform_1(%arg0: i32) -> (i32, i32) {
    %c0_i32 = arith.constant 0 : i32
    %c0_i32_0 = arith.constant 0 : i32
    %c0_i32_1 = arith.constant 0 : i32
    return %c0_i32, %c0_i32_0 : i32, i32
  }
  func.func @transform_2(%arg0: i32) -> (i32, i32) {
    %c0_i32 = arith.constant 0 : i32
    %c0_i32_0 = arith.constant 0 : i32
    %c0_i32_1 = arith.constant 0 : i32
    return %c0_i32, %c0_i32_0 : i32, i32
  }
  func.func @transform_3(%arg0: i32) -> (i32, i32) {
    %c0_i32 = arith.constant 0 : i32
    %c0_i32_0 = arith.constant 0 : i32
    return %arg0, %c0_i32 : i32, i32
  }
}

</mosaic_0001>

<bundles_post_ra>
// kernel: tpu_custom_call.1
= control target key start
LH: loop header
LB: loop body
LE: loop exit
PB: predicated region body
PF: predicated region fallthrough
CT: control target
= control target key end

     0   :  { %s1256_s0 = inlined_call_operand.vmem [shape: f32[48,32], index: 0, kind: input, shape index: {}]   ;;  %s1257_s1 = inlined_call_operand.vmem [shape: f32[32,128], index: 1, kind: input, shape index: {}]   ;;  %s1258_s2 = inlined_call_operand.vmem [shape: f32[1,32], index: 2, kind: input, shape index: {}]   ;;  %s1259_s3 = inlined_call_operand.hbm [shape: f32[16,32], index: 3, kind: output, shape index: {}]  }
   0x1   :  { %v1071_v0 = vld [vmem:[%s1257_s1 + $0x18] sm:$0xff]  ;;  %v1076_v1 = vld [vmem:[%s1257_s1 + $0x10] sm:$0xff]  ;;  %v1084_v3 = vld [vmem:[%s1257_s1 + $0x8] sm:$0xff] }
   0x2   :  { %57 = vmatpush.msra.mxu0 %v1071_v0  ;;  %v962_v2 = vpack.i.bf16 %v1076_v1, %v1071_v0  ;;  %v1089_v4 = vld [vmem:[%s1257_s1] sm:$0xff] }
   0x3   :  { %v967_v5 = vpack.i.bf16 %v1089_v4, %v1084_v3 }
   0x4   :  { %58 = vmatpush.msra.mxu0 %v1076_v1 }
   0x5   :  { %8 = vsyncpa [#allocation3], 0  ;;  %v15_v6 = vld [vmem:[%s1256_s0] sm:$0xff]  ;;  %vm26_vm0 = vcmask 261120   ;;  %v16_v7 = vld [vmem:[%s1256_s0 + $0x8] sm:$0xff]  ;;  %s1031_s4 = smov 104  }
   0x6   :  { %59 = vmatpush.msra.mxu0 %v1084_v3  ;;  %v17_v8 = vld [vmem:[%s1256_s0 + $0x10] sm:$0xff]  ;;  %v18_v9 = vld [vmem:[%s1256_s0 + $0x18] sm:$0xff]  ;;  %v19_v10 = vld [vmem:[%s1256_s0 + $0x20] sm:$0xff]  ;;  %s1032_s5 = smov 120   ;;  %s1033_s6 = smov 88   ;;  %vm87_vm1 = vcmask 64512  }
   0x7   :  { %v20_v11 = vld [vmem:[%s1256_s0 + $0x28] sm:$0xff]  ;;  %s1034_s7 = smov 112   ;;  %s1035_s8 = smov 96   ;;  %vm341_vm2 = vcmask 130048  }
   0x8   :  { %60 = vmatpush.msra.mxu0 %v1089_v4  ;;  %s1036_s9 = smov 80   ;;  %s1037_s0 = smov 72  }
   0x9   :  { %865 = vmatmul.msk.f32.vlgmr.msra.gmra.mxu0 %vm26_vm0, %v15_v6  ;;  %s1038_s10 = smov 64   ;;  %s1039_s11 = smov 56  }
   0xa   :  { %s1040_s12 = smov 40   ;;  %s1041_s13 = smov 48  }
   0xb   :  { %s1042_s14 = smov 32   ;;  %s1043_s15 = smov 8  }
   0xc   :  { %s1044_s16 = smov 16   ;;  %s1045_s17 = smov 24  }
   0xd   :  { %s853_s22 = sshll.u32 %s1259_s3, 4  ;;  %s1046_s1 = smov [#allocation2]   ;;  %s854_s22 = int_to_ptr.hbm [resolvable:$true] %s853_s22 }
   0xe   :  { %s851_s23 = sshll.u32 %s1046_s1, 4  ;;  %s1047_s24 = smov 128   ;;  %s852_s23 = int_to_ptr.vmem [resolvable:$true] %s851_s23 }
  0x11   :  { %866 = vmatmul.msk.f32.gmra.mxu0 %vm26_vm0, %v16_v7 }
  0x19   :  { %867 = vmatmul.msk.f32.gmra.mxu0 %vm26_vm0, %v17_v8 }
  0x21   :  { %868 = vmatmul.msk.f32.gmra.mxu0 %vm26_vm0, %v18_v9 }
  0x29   :  { %869 = vmatmul.msk.f32.gmra.mxu0 %vm26_vm0, %v19_v10 }
  0x31   :  { %870 = vmatmul.msk.f32.gmra.mxu0 %vm26_vm0, %v20_v11 }
  0x86   :  { %v62_v12 = vpop.f32.mrf.mxu0 }
  0x87   :  { %v80_v13 = vmul.f32 0.17677669, %v62_v12 }
  0x89   :  { %179 = vrot.lane.b32.xlu2 %v80_v13, %s1031_s4  ;;  %115 = vrot.lane.b32.xlu1 %v80_v13, %s1032_s5 }
  0x8e   :  { %v65_v14 = vpop.f32.mrf.mxu0 }
  0x8f   :  { %117 = vrot.lane.b32.xlu0 %v65_v14, %s1033_s6 }
  0x91   :  { %147 = vrot.lane.b32.xlu1 %v80_v13, %s1034_s7  ;;  %83 = vrot.lane.b32.xlu2 %v65_v14, %s1035_s8 }
  0x96   :  { %v68_v15 = vpop.f32.mrf.mxu0 }
  0x97   :  { %149 = vrot.lane.b32.xlu0 %v65_v14, %s1036_s9  ;;  %v1121_v16 = vpack.i.bf16 %v65_v14, %v68_v15 }
  0x99   :  { %181 = vrot.lane.b32.xlu2 %v65_v14, %s1037_s0  ;;  %85 = vrot.lane.b32.xlu1 %v68_v15, %s1035_s8 }
  0x9e   :  { %v71_v17 = vpop.f32.mrf.mxu0 }
  0x9f   :  { %119 = vrot.lane.b32.xlu0 %v68_v15, %s1033_s6  ;;  %v211_v18 = vmul.f32 0.17677669, %v71_v17 }
  0xa1   :  { %151 = vrot.lane.b32.xlu2 %v68_v15, %s1036_s9 }
  0xa6   :  { %v74_v19 = vpop.f32.mrf.mxu0 }
  0xa7   :  { %245 = vrot.lane.b32.xlu0 %v211_v18, %s1032_s5  ;;  %247 = vrot.lane.b32.xlu1 %v74_v19, %s1033_s6 }
  0xa9   :  { %183 = vrot.lane.b32.xlu2 %v68_v15, %s1037_s0 }
  0xae   :  { %v77_v20 = vpop.f32.mrf.mxu0 }
  0xaf   :  { %214 = vrot.lane.b32.xlu0 %v74_v19, %s1035_s8  ;;  %249 = vrot.lane.b32.xlu1 %v77_v20, %s1033_s6  ;;  %v1123_v21 = vpack.i.bf16 %v74_v19, %v77_v20 }
  0xb1   :  { %313 = vrot.lane.b32.xlu2 %v77_v20, %s1037_s0 }
  0xb7   :  { %281 = vrot.lane.b32.xlu1 %v77_v20, %s1036_s9  ;;  %216 = vrot.lane.b32.xlu0 %v77_v20, %s1035_s8 }
  0xb9   :  { %277 = vrot.lane.b32.xlu2 %v211_v18, %s1034_s7 }
  0xbf   :  { %311 = vrot.lane.b32.xlu1 %v74_v19, %s1037_s0  ;;  %279 = vrot.lane.b32.xlu0 %v74_v19, %s1036_s9 }
  0xc7   :  { %309 = vrot.lane.b32.xlu0 %v211_v18, %s1031_s4 }
  0xcf   :  { %923 = vrot.lane.b32.xlu0 %v1121_v16, %s1038_s10 }
  0xe3   :  { %v180_v22 = vpop.permute.xlu2 %179 }
  0xeb   :  { %v84_v23 = vpop.permute.xlu2 %83 }
  0xf3   :  { %v182_v25 = vpop.permute.xlu2 %181 }
  0xfb   :  { %v116_v24 = vpop.permute.xlu1 %115  ;;  %v152_v28 = vpop.permute.xlu2 %151 }
 0x101   :  { %v118_v26 = vpop.permute.xlu0 %117 }
 0x103   :  { %v148_v27 = vpop.permute.xlu1 %147  ;;  %v184_v31 = vpop.permute.xlu2 %183 }
 0x109   :  { %v150_v29 = vpop.permute.xlu0 %149 }
 0x10b   :  { %v86_v30 = vpop.permute.xlu1 %85  ;;  %v314_v39 = vpop.permute.xlu2 %313 }
 0x10c   :  { %871 = vmatpush.xpose.msk.msra.mxu1 %vm87_vm1, %v86_v30 }
 0x110   :  { %872 = vmatpush.xpose.msk.msra.mxu1 %vm87_vm1, %v84_v23 }
 0x111   :  { %v120_v32 = vpop.permute.xlu0 %119 }
 0x112   :  { %874 = vmatpush.xpose.msk.msra.mxu3 %vm87_vm1, %v120_v32 }
 0x113   :  { %873 = vmatmul.msk.f32.vlgmr.msra.gmra.mxu1 %vm87_vm1, %v80_v13  ;;  %v278_v42 = vpop.permute.xlu2 %277 }
 0x114   :  { %880 = vmatpush.xpose.msk.msrb.mxu1 %vm87_vm1, %v184_v31 }
 0x116   :  { %875 = vmatpush.xpose.msk.msra.mxu3 %vm87_vm1, %v118_v26 }
 0x118   :  { %881 = vmatpush.xpose.msk.msrb.mxu1 %vm87_vm1, %v182_v25 }
 0x119   :  { %876 = vmatmul.msk.f32.vlgmr.msra.gmra.mxu3 %vm87_vm1, %v116_v24  ;;  %v246_v33 = vpop.permute.xlu0 %245  ;;  %v248_v34 = vpop.permute.xlu1 %247 }
 0x11a   :  { %877 = vmatpush.xpose.msk.msrb.mxu3 %vm87_vm1, %v152_v28 }
 0x11b   :  { %882 = vmatmul.msk.f32.vlgmr.msrb.gmra.mxu1 %vm87_vm1, %v180_v22 }
 0x11e   :  { %878 = vmatpush.xpose.msk.msrb.mxu3 %vm87_vm1, %v150_v29 }
 0x121   :  { %879 = vmatmul.msk.f32.vlgmr.msrb.gmra.mxu3 %vm87_vm1, %v148_v27  ;;  %v215_v35 = vpop.permute.xlu0 %214  ;;  %v250_v36 = vpop.permute.xlu1 %249 }
 0x122   :  { %886 = vmatpush.xpose.msk.msra.mxu3 %vm87_vm1, %v250_v36 }
 0x126   :  { %887 = vmatpush.xpose.msk.msra.mxu3 %vm87_vm1, %v248_v34 }
 0x129   :  { %888 = vmatmul.msk.f32.vlgmr.msra.gmra.mxu3 %vm87_vm1, %v246_v33  ;;  %v282_v37 = vpop.permute.xlu1 %281  ;;  %v217_v38 = vpop.permute.xlu0 %216 }
 0x12a   :  { %883 = vmatpush.xpose.msk.msra.mxu2 %vm87_vm1, %v217_v38  ;;  %889 = vmatpush.xpose.msk.msra.mxu1 %vm87_vm1, %v282_v37 }
 0x12e   :  { %884 = vmatpush.xpose.msk.msra.mxu2 %vm87_vm1, %v215_v35 }
 0x131   :  { %v312_v40 = vpop.permute.xlu1 %311  ;;  %885 = vmatmul.msk.f32.vlgmr.msra.gmra.mxu2 %vm87_vm1, %v211_v18  ;;  %v280_v41 = vpop.permute.xlu0 %279 }
 0x132   :  { %892 = vmatpush.xpose.msk.msrb.mxu2 %vm87_vm1, %v314_v39  ;;  %890 = vmatpush.xpose.msk.msra.mxu1 %vm87_vm1, %v280_v41 }
 0x135   :  { %891 = vmatmul.msk.f32.vlgmr.msra.gmra.mxu1 %vm87_vm1, %v278_v42 }
 0x136   :  { %893 = vmatpush.xpose.msk.msrb.mxu2 %vm87_vm1, %v312_v40 }
 0x139   :  { %v310_v43 = vpop.permute.xlu0 %309 }
 0x13a   :  { %894 = vmatmul.msk.f32.vlgmr.msrb.gmra.mxu2 %vm87_vm1, %v310_v43 }
 0x141   :  { %v924_v44 = vpop.permute.xlu0 %923 }
 0x142   :  { %v925_v45 = vunpack.i.l.bf16 %v924_v44  ;;  %v926_v46 = vunpack.i.h.bf16 %v924_v44 }
 0x144   :  { %557 = vmatpush.msrb.mxu3 %v925_v45 }
 0x146   :  { %558 = vmatpush.msrb.mxu3 %v926_v46 }
 0x190   :  { %v112_v47 = vpop.f32.mrf.mxu1 }
 0x191   :  { %v342_v48 = vsel %vm341_vm2, %v112_v47, -inf }
 0x192   :  { %343 = vmax.xlane.f32.xlu1 %v342_v48 }
 0x198   :  { %v208_v51 = vpop.f32.mrf.mxu1 }
 0x199   :  { %v351_v53 = vsel %vm341_vm2, %v208_v51, -inf }
 0x19c   :  { %v144_v49 = vpop.f32.mrf.mxu3 }
 0x19d   :  { %v345_v50 = vsel %vm341_vm2, %v144_v49, -inf }
 0x19e   :  { %346 = vmax.xlane.f32.xlu2 %v345_v50 }
 0x1a4   :  { %v176_v52 = vpop.f32.mrf.mxu3 }
 0x1a5   :  { %v348_v54 = vsel %vm341_vm2, %v176_v52, -inf }
 0x1a6   :  { %352 = vmax.xlane.f32.xlu2 %v351_v53  ;;  %349 = vmax.xlane.f32.xlu0 %v348_v54 }
 0x1ac   :  { %v274_v55 = vpop.f32.mrf.mxu3 }
 0x1ad   :  { %v357_v56 = vsel %vm341_vm2, %v274_v55, -inf }
 0x1ae   :  { %358 = vmax.xlane.f32.xlu2 %v357_v56 }
 0x1b2   :  { %v306_v57 = vpop.f32.mrf.mxu1 }
 0x1b3   :  { %v360_v58 = vsel %vm341_vm2, %v306_v57, -inf }
 0x1b4   :  { %v242_v59 = vpop.f32.mrf.mxu2  ;;  %361 = vmax.xlane.f32.xlu0 %v360_v58 }
 0x1b5   :  { %v354_v60 = vsel %vm341_vm2, %v242_v59, -inf }
 0x1b6   :  { %355 = vmax.xlane.f32.xlu1 %v354_v60 }
 0x1bd   :  { %v1167_v61 = vpop.f32.mrf.mxu2 }
 0x1be   :  { %v363_v62 = vsel %vm341_vm2, %v1167_v61, -inf }
 0x1c6   :  { %928 = vrot.lane.b32.xlu2 %v1121_v16, %s1039_s11 }
 0x1c8   :  { %938 = vrot.lane.b32.xlu0 %v1121_v16, %s1040_s12 }
 0x1cf   :  { %933 = vrot.lane.b32.xlu1 %v1121_v16, %s1041_s13 }
 0x1d0   :  { %943 = vrot.lane.b32.xlu0 %v1123_v21, %s1038_s10 }
 0x1f9   :  { %364 = vmax.xlane.f32.xlu1 %v363_v62 }
 0x205   :  { %v344_v63 = vpop.xlane.xlu1 %343 }
 0x206   :  { %v366_v6 = vsub.f32 %v112_v47, %v344_v63 }
 0x208   :  { %v374_v7 = vmul.f32 1.442695, %v366_v6 }
 0x20a   :  { %973 = vpow2.f32 %v374_v7 }
 0x210   :  { %v1171_v8 = vpop.eup %973 }
 0x211   :  { %v347_v9 = vpop.xlane.xlu2 %346  ;;  %v390_v10 = vsel %vm341_vm2, %v1171_v8, 0.0 }
 0x212   :  { %v367_v11 = vsub.f32 %v144_v49, %v347_v9  ;;  %391 = vadd.xlane.f32.xlu2 %v390_v10 }
 0x214   :  { %v376_v12 = vmul.f32 1.442695, %v367_v11 }
 0x216   :  { %975 = vpow2.f32 %v376_v12 }
 0x219   :  { %v353_v13 = vpop.xlane.xlu2 %352  ;;  %v350_v14 = vpop.xlane.xlu0 %349 }
 0x21a   :  { %v369_v15 = vsub.f32 %v208_v51, %v353_v13  ;;  %v368_v16 = vsub.f32 %v176_v52, %v350_v14 }
 0x21c   :  { %v1175_v17 = vpop.eup %975  ;;  %v380_v18 = vmul.f32 1.442695, %v369_v15  ;;  %v378_v19 = vmul.f32 1.442695, %v368_v16 }
 0x21d   :  { %v393_v20 = vsel %vm341_vm2, %v1175_v17, 0.0 }
 0x21e   :  { %977 = vpow2.f32 %v380_v18  ;;  %394 = vadd.xlane.f32.xlu0 %v393_v20 }
 0x21f   :  { %979 = vpow2.f32 %v378_v19 }
 0x221   :  { %v359_v22 = vpop.xlane.xlu2 %358 }
 0x222   :  { %v371_v23 = vsub.f32 %v274_v55, %v359_v22 }
 0x224   :  { %v1179_v24 = vpop.eup %977  ;;  %v384_v25 = vmul.f32 1.442695, %v371_v23 }
 0x225   :  { %v1181_v26 = vpop.eup %979  ;;  %v399_v27 = vsel %vm341_vm2, %v1179_v24, 0.0 }
 0x226   :  { %981 = vpow2.f32 %v384_v25  ;;  %400 = vadd.xlane.f32.xlu2 %v399_v27  ;;  %v396_v28 = vsel %vm341_vm2, %v1181_v26, 0.0 }
 0x227   :  { %397 = vadd.xlane.f32.xlu1 %v396_v28  ;;  %v362_v29 = vpop.xlane.xlu0 %361 }
 0x228   :  { %v372_v30 = vsub.f32 %v306_v57, %v362_v29 }
 0x229   :  { %v929_v31 = vpop.permute.xlu2 %928  ;;  %v356_v32 = vpop.xlane.xlu1 %355 }
 0x22a   :  { %v386_v33 = vmul.f32 1.442695, %v372_v30  ;;  %v930_v34 = vunpack.i.l.bf16 %v929_v31  ;;  %v370_v35 = vsub.f32 %v242_v59, %v356_v32  ;;  %v931_v37 = vunpack.i.h.bf16 %v929_v31 }
 0x22c   :  { %v1187_v36 = vpop.eup %981  ;;  %983 = vpow2.f32 %v386_v33  ;;  %v382_v38 = vmul.f32 1.442695, %v370_v35  ;;  %586 = vmatpush.msrb.mxu1 %v930_v34 }
 0x22d   :  { %v405_v39 = vsel %vm341_vm2, %v1187_v36, 0.0 }
 0x22e   :  { %985 = vpow2.f32 %v382_v38  ;;  %587 = vmatpush.msrb.mxu1 %v931_v37 }
 0x22f   :  { %406 = vadd.xlane.f32.xlu1 %v405_v39 }
 0x232   :  { %v1191_v40 = vpop.eup %983 }
 0x233   :  { %v408_v41 = vsel %vm341_vm2, %v1191_v40, 0.0 }
 0x234   :  { %v1195_v42 = vpop.eup %985  ;;  %409 = vadd.xlane.f32.xlu2 %v408_v41 }
 0x235   :  { %v402_v43 = vsel %vm341_vm2, %v1195_v42, 0.0 }
 0x236   :  { %403 = vadd.xlane.f32.xlu0 %v402_v43 }
 0x23a   :  { %v939_v44 = vpop.permute.xlu0 %938 }
 0x23b   :  { %v940_v45 = vunpack.i.l.bf16 %v939_v44  ;;  %v941_v46 = vunpack.i.h.bf16 %v939_v44 }
 0x23d   :  { %644 = vmatpush.msra.mxu3 %v940_v45 }
 0x23f   :  { %645 = vmatpush.msra.mxu3 %v941_v46 }
 0x241   :  { %v934_v47 = vpop.permute.xlu1 %933 }
 0x242   :  { %v935_v48 = vunpack.i.l.bf16 %v934_v47  ;;  %v944_v49 = vpop.permute.xlu0 %943  ;;  %v936_v51 = vunpack.i.h.bf16 %v934_v47 }
 0x243   :  { %v945_v50 = vunpack.i.l.bf16 %v944_v49  ;;  %v946_v52 = vunpack.i.h.bf16 %v944_v49 }
 0x244   :  { %615 = vmatpush.msra.mxu2 %v935_v48 }
 0x245   :  { %689 = vmatpush.msra.mxu1 %v945_v50 }
 0x246   :  { %616 = vmatpush.msra.mxu2 %v936_v51 }
 0x247   :  { %690 = vmatpush.msra.mxu1 %v946_v52 }
 0x24a   :  { %958 = vrot.lane.b32.xlu0 %v1123_v21, %s1040_s12 }
 0x24c   :  { %948 = vrot.lane.b32.xlu2 %v1123_v21, %s1039_s11 }
 0x252   :  { %968 = vrot.lane.b32.xlu0 %v967_v5, %s1042_s14 }
 0x254   :  { %963 = vrot.lane.b32.xlu2 %v962_v2, %s1042_s14 }
 0x26c   :  { %v365_v53 = vpop.xlane.xlu1 %364 }
 0x26d   :  { %v373_v54 = vsub.f32 %v1167_v61, %v365_v53 }
 0x26f   :  { %v388_v55 = vmul.f32 1.442695, %v373_v54 }
 0x271   :  { %987 = vpow2.f32 %v388_v55 }
 0x277   :  { %v1204_v56 = vpop.eup %987 }
 0x278   :  { %v411_v57 = vsel %vm341_vm2, %v1204_v56, 0.0 }
 0x279   :  { %412 = vadd.xlane.f32.xlu1 %v411_v57 }
 0x285   :  { %v392_v58 = vpop.xlane.xlu2 %391 }
 0x286   :  { %989 = vrcp.f32 %v392_v58  ;;  %v425_v63 = vand.u32 2147483648, %v392_v58  ;;  %v423_v7 = vand.u32 2147483647, %v392_v58  ;;  %vm419_vm4 = vweird.f32 %v392_v58 }
 0x288   :  { %v426_v10 = vor.u32 1.1754944e-38, %v425_v63  ;;  %vm424_vm6 = vcmp.eq.f32.partialorder %v423_v7, 8.507059e+37 }
 0x28c   :  { %v990_v59 = vpop.eup %989 }
 0x28d   :  { %v415_v60 = vmul.f32 %v990_v59, %v392_v58  ;;  %vm420_vm3 = vweird.f32 %v990_v59 }
 0x28e   :  { %vm421_vm5 = vmor %vm419_vm4, %vm420_vm3 }
 0x28f   :  { %v416_v62 = vsub.f32 1.0, %v415_v60 }
 0x291   :  { %v417_v6 = vmul.f32 %v990_v59, %v416_v62  ;;  %v395_v9 = vpop.xlane.xlu0 %394 }
 0x292   :  { %991 = vrcp.f32 %v395_v9  ;;  %953 = vrot.lane.b32.xlu1 %v1123_v21, %s1041_s13  ;;  %v440_v20 = vand.u32 2147483648, %v395_v9  ;;  %v438_v22 = vand.u32 2147483647, %v395_v9  ;;  %vm434_vm8 = vweird.f32 %v395_v9 }
 0x293   :  { %v418_v61 = vadd.f32 %v990_v59, %v417_v6 }
 0x294   :  { %v441_v27 = vor.u32 1.1754944e-38, %v440_v20  ;;  %vm439_vm10 = vcmp.eq.f32.partialorder %v438_v22, 8.507059e+37 }
 0x295   :  { %v422_v11 = vsel %vm421_vm5, %v990_v59, %v418_v61 }
 0x296   :  { %v427_v12 = vsel %vm424_vm6, %v426_v10, %v422_v11 }
 0x297   :  { %v428_v13 = vmul.f32 %v1171_v8, %v427_v12 }
 0x298   :  { %v992_v14 = vpop.eup %991 }
 0x299   :  { %v430_v15 = vmul.f32 %v992_v14, %v395_v9  ;;  %v401_v16 = vpop.xlane.xlu2 %400  ;;  %895 = vmatmul.msk.f32.vlgmr.msrb.gmra.mxu3 %vm341_vm2, %v428_v13  ;;  %vm435_vm7 = vweird.f32 %v992_v14 }
 0x29a   :  { %993 = vrcp.f32 %v401_v16  ;;  %v398_v18 = vpop.xlane.xlu1 %397  ;;  %vm436_vm9 = vmor %vm434_vm8, %vm435_vm7  ;;  %v470_v34 = vand.u32 2147483648, %v401_v16  ;;  %v468_v39 = vand.u32 2147483647, %v401_v16  ;;  %vm464_vm13 = vweird.f32 %v401_v16 }
 0x29b   :  { %v431_v19 = vsub.f32 1.0, %v430_v15  ;;  %995 = vrcp.f32 %v398_v18  ;;  %v455_v41 = vand.u32 2147483648, %v398_v18  ;;  %v453_v44 = vand.u32 2147483647, %v398_v18 }
 0x29c   :  { %v471_v46 = vor.u32 1.1754944e-38, %v470_v34  ;;  %vm449_vm15 = vweird.f32 %v398_v18  ;;  %vm469_vm3 = vcmp.eq.f32.partialorder %v468_v39, 8.507059e+37 }
 0x29d   :  { %v432_v21 = vmul.f32 %v992_v14, %v431_v19  ;;  %v456_v1 = vor.u32 1.1754944e-38, %v455_v41  ;;  %vm454_vm5 = vcmp.eq.f32.partialorder %v453_v44, 8.507059e+37 }
 0x29f   :  { %v433_v23 = vadd.f32 %v992_v14, %v432_v21 }
 0x2a0   :  { %v994_v25 = vpop.eup %993 }
 0x2a1   :  { %v996_v28 = vpop.eup %995  ;;  %v437_v8 = vsel %vm436_vm9, %v992_v14, %v433_v23  ;;  %v460_v29 = vmul.f32 %v994_v25, %v401_v16  ;;  %vm465_vm11 = vweird.f32 %v994_v25 }
 0x2a2   :  { %v442_v30 = vsel %vm439_vm10, %v441_v27, %v437_v8  ;;  %v445_v31 = vmul.f32 %v996_v28, %v398_v18  ;;  %v407_v32 = vpop.xlane.xlu1 %406  ;;  %vm450_vm12 = vweird.f32 %v996_v28  ;;  %vm466_vm14 = vmor %vm464_vm13, %vm465_vm11 }
 0x2a3   :  { %v461_v33 = vsub.f32 1.0, %v460_v29  ;;  %997 = vrcp.f32 %v407_v32  ;;  %v443_v37 = vmul.f32 %v1175_v17, %v442_v30  ;;  %vm451_vm4 = vmor %vm449_vm15, %vm450_vm12  ;;  %v500_v51 = vand.u32 2147483648, %v407_v32 }
 0x2a4   :  { %v446_v35 = vsub.f32 1.0, %v445_v31  ;;  %v498_v55 = vand.u32 2147483647, %v407_v32  ;;  %vm494_vm7 = vweird.f32 %v407_v32 }
 0x2a5   :  { %v462_v38 = vmul.f32 %v994_v25, %v461_v33  ;;  %896 = vmatmul.msk.f32.vlgmr.msrb.gmra.mxu1 %vm341_vm2, %v443_v37  ;;  %v501_v62 = vor.u32 1.1754944e-38, %v500_v51 }
 0x2a6   :  { %v447_v43 = vmul.f32 %v996_v28, %v446_v35  ;;  %vm499_vm9 = vcmp.eq.f32.partialorder %v498_v55, 8.507059e+37 }
 0x2a7   :  { %v463_v45 = vadd.f32 %v994_v25, %v462_v38  ;;  %v1220_v17 = vpop.xlane.xlu2 %409 }
 0x2a8   :  { %v448_v47 = vadd.f32 %v996_v28, %v447_v43  ;;  %v515_v38 = vand.u32 2147483648, %v1220_v17  ;;  %v513_v39 = vand.u32 2147483647, %v1220_v17 }
 0x2a9   :  { %v998_v48 = vpop.eup %997  ;;  %v467_v0 = vsel %vm466_vm14, %v994_v25, %v463_v45  ;;  %v404_v2 = vpop.xlane.xlu0 %403 }
 0x2aa   :  { %v472_v3 = vsel %vm469_vm3, %v471_v46, %v467_v0  ;;  %v452_v4 = vsel %vm451_vm4, %v996_v28, %v448_v47  ;;  %v490_v5 = vmul.f32 %v998_v48, %v407_v32  ;;  %999 = vrcp.f32 %v404_v2 }
 0x2ab   :  { %v457_v49 = vsel %vm454_vm5, %v456_v1, %v452_v4  ;;  %v473_v53 = vmul.f32 %v1179_v24, %v472_v3  ;;  %vm495_vm6 = vweird.f32 %v998_v48  ;;  %v485_v61 = vand.u32 2147483648, %v404_v2 }
 0x2ac   :  { %v491_v50 = vsub.f32 1.0, %v490_v5  ;;  %v458_v52 = vmul.f32 %v1181_v26, %v457_v49  ;;  %vm496_vm8 = vmor %vm494_vm7, %vm495_vm6  ;;  %v483_v11 = vand.u32 2147483647, %v404_v2  ;;  %vm479_vm11 = vweird.f32 %v404_v2 }
 0x2ad   :  { %898 = vmatmul.msk.f32.vlgmr.msra.gmra.mxu3 %vm341_vm2, %v473_v53  ;;  %v486_v13 = vor.u32 1.1754944e-38, %v485_v61  ;;  %1001 = vrcp.f32 %v1220_v17  ;;  %vm509_vm6 = vweird.f32 %v1220_v17  ;;  %v516_v43 = vor.u32 1.1754944e-38, %v515_v38 }
 0x2ae   :  { %v492_v54 = vmul.f32 %v998_v48, %v491_v50  ;;  %897 = vmatmul.msk.f32.vlgmr.msra.gmra.mxu2 %vm341_vm2, %v458_v52  ;;  %vm484_vm13 = vcmp.eq.f32.partialorder %v483_v11, 8.507059e+37 }
 0x2af   :  { %v949_v57 = vpop.permute.xlu2 %948 }
 0x2b0   :  { %v493_v58 = vadd.f32 %v998_v48, %v492_v54  ;;  %v950_v59 = vunpack.i.l.bf16 %v949_v57  ;;  %v1000_v60 = vpop.eup %999  ;;  %v951_v26 = vunpack.i.h.bf16 %v949_v57 }
 0x2b1   :  { %v475_v6 = vmul.f32 %v1000_v60, %v404_v2  ;;  %vm480_vm10 = vweird.f32 %v1000_v60 }
 0x2b2   :  { %v497_v63 = vsel %vm496_vm8, %v998_v48, %v493_v58  ;;  %718 = vmatpush.msrb.mxu2 %v950_v59  ;;  %vm481_vm12 = vmor %vm479_vm11, %vm480_vm10  ;;  %vm514_vm8 = vcmp.eq.f32.partialorder %v513_v39, 8.507059e+37 }
 0x2b3   :  { %v502_v24 = vsel %vm499_vm9, %v501_v62, %v497_v63  ;;  %v476_v7 = vsub.f32 1.0, %v475_v6  ;;  %v1002_v21 = vpop.eup %1001  ;;  %vm664_vm9 = vcmask 195584  }
 0x2b4   :  { %719 = vmatpush.msrb.mxu2 %v951_v26  ;;  %v503_v9 = vmul.f32 %v1187_v36, %v502_v24  ;;  %v505_v22 = vmul.f32 %v1002_v21, %v1220_v17  ;;  %vm510_vm5 = vweird.f32 %v1002_v21 }
 0x2b5   :  { %v477_v10 = vmul.f32 %v1000_v60, %v476_v7  ;;  %vm511_vm7 = vmor %vm509_vm6, %vm510_vm5 }
 0x2b6   :  { %900 = vmatmul.msk.f32.vlgmr.msrb.gmra.mxu2 %vm341_vm2, %v503_v9  ;;  %v506_v27 = vsub.f32 1.0, %v505_v22  ;;  %v972_v9 = vld [vmem:[%s1258_s2] ss:$0 sm:$0xff] }
 0x2b7   :  { %v478_v12 = vadd.f32 %v1000_v60, %v477_v10  ;;  %v964_v3 = vpop.permute.xlu2 %963 }
 0x2b8   :  { %v507_v30 = vmul.f32 %v1002_v21, %v506_v27  ;;  %v966_v4 = vunpack.i.h.bf16 %v964_v3 }
 0x2b9   :  { %v482_v14 = vsel %vm481_vm12, %v1000_v60, %v478_v12 }
 0x2ba   :  { %v487_v15 = vsel %vm484_vm13, %v486_v13, %v482_v14  ;;  %v508_v35 = vadd.f32 %v1002_v21, %v507_v30 }
 0x2bb   :  { %v488_v18 = vmul.f32 %v1195_v42, %v487_v15 }
 0x2bc   :  { %v959_v16 = vpop.permute.xlu0 %958  ;;  %v512_v41 = vsel %vm511_vm7, %v1002_v21, %v508_v35 }
 0x2bd   :  { %v960_v19 = vunpack.i.l.bf16 %v959_v16  ;;  %899 = vmatmul.msk.f32.vlgmr.msra.gmra.mxu1 %vm341_vm2, %v488_v18  ;;  %v961_v36 = vunpack.i.h.bf16 %v959_v16  ;;  %v517_v45 = vsel %vm514_vm8, %v516_v43, %v512_v41 }
 0x2be   :  { %v518_v48 = vmul.f32 %v1191_v40, %v517_v45  ;;  %v965_v40 = vunpack.i.l.bf16 %v964_v3 }
 0x2bf   :  { %776 = vmatpush.msrb.mxu1 %v960_v19 }
 0x2c0   :  { %834 = vmatpush.msra.mxu2 %v965_v40 }
 0x2c1   :  { %777 = vmatpush.msrb.mxu1 %v961_v36 }
 0x2c2   :  { %835 = vmatpush.msra.mxu2 %v966_v4 }
 0x2c4   :  { %v969_v49 = vpop.permute.xlu0 %968 }
 0x2c5   :  { %v971_v50 = vunpack.i.h.bf16 %v969_v49  ;;  %v970_v51 = vunpack.i.l.bf16 %v969_v49 }
 0x2c7   :  { %836 = vmatpush.msra.mxu2 %v970_v51 }
 0x2c9   :  { %837 = vmatpush.msra.mxu2 %v971_v50 }
 0x2ec   :  { %v413_v20 = vpop.xlane.xlu1 %412 }
 0x2ed   :  { %1003 = vrcp.f32 %v413_v20  ;;  %v530_v8 = vand.u32 2147483648, %v413_v20  ;;  %v528_v42 = vand.u32 2147483647, %v413_v20  ;;  %vm524_vm15 = vweird.f32 %v413_v20 }
 0x2ef   :  { %v531_v32 = vor.u32 1.1754944e-38, %v530_v8  ;;  %vm529_vm4 = vcmp.eq.f32.partialorder %v528_v42, 8.507059e+37 }
 0x2f3   :  { %v1004_v23 = vpop.eup %1003 }
 0x2f4   :  { %v520_v25 = vmul.f32 %v1004_v23, %v413_v20  ;;  %vm525_vm14 = vweird.f32 %v1004_v23 }
 0x2f5   :  { %vm526_vm3 = vmor %vm524_vm15, %vm525_vm14 }
 0x2f6   :  { %v521_v28 = vsub.f32 1.0, %v520_v25 }
 0x2f8   :  { %v522_v29 = vmul.f32 %v1004_v23, %v521_v28 }
 0x2fa   :  { %v523_v31 = vadd.f32 %v1004_v23, %v522_v29 }
 0x2fc   :  { %v527_v33 = vsel %vm526_vm3, %v1004_v23, %v523_v31 }
 0x2fd   :  { %v532_v34 = vsel %vm529_vm4, %v531_v32, %v527_v33 }
 0x2fe   :  { %v533_v37 = vmul.f32 %v1204_v56, %v532_v34 }
 0x300   :  { %902 = vmatmul.msk.f32.vlgmr.msrb.gmra.mxu1 %vm341_vm2, %v533_v37 }
 0x304   :  { %v954_v44 = vpop.permute.xlu1 %953 }
 0x305   :  { %v955_v46 = vunpack.i.l.bf16 %v954_v44  ;;  %v956_v47 = vunpack.i.h.bf16 %v954_v44 }
 0x307   :  { %747 = vmatpush.msrb.mxu3 %v955_v46 }
 0x309   :  { %748 = vmatpush.msrb.mxu3 %v956_v47 }
 0x30a   :  { %901 = vmatmul.msk.f32.vlgmr.msrb.gmra.mxu3 %vm341_vm2, %v518_v48 }
 0x31c   :  { %v560_v17 = vpop.f32.mrf.mxu3 }
 0x322   :  { %v589_v56 = vpop.f32.mrf.mxu1 }
 0x323   :  { %651 = vrot.lane.b32.xlu1 %v589_v56, %s1043_s15 }
 0x330   :  { %v647_v1 = vpop.f32.mrf.mxu3 }
 0x331   :  { %v618_v0 = vpop.f32.mrf.mxu2  ;;  %659 = vrot.lane.b32.xlu1 %v647_v1, %s1045_s17 }
 0x332   :  { %655 = vrot.lane.b32.xlu2 %v618_v0, %s1044_s16 }
 0x339   :  { %v721_v2 = vpop.f32.mrf.mxu2 }
 0x33a   :  { %783 = vrot.lane.b32.xlu0 %v721_v2, %s1043_s15  ;;  %v692_v5 = vpop.f32.mrf.mxu1 }
 0x37d   :  { %v779_v52 = vpop.f32.mrf.mxu1 }
 0x37e   :  { %791 = vrot.lane.b32.xlu1 %v779_v52, %s1045_s17 }
 0x38c   :  { %v656_v57 = vpop.permute.xlu2 %655 }
 0x38d   :  { %v750_v53 = vpop.f32.mrf.mxu3 }
 0x38e   :  { %787 = vrot.lane.b32.xlu2 %v750_v53, %s1044_s16 }
 0x395   :  { %v652_v54 = vpop.permute.xlu1 %651 }
 0x396   :  { %v662_v55 = vsel %vm87_vm1, %v560_v17, %v652_v54 }
 0x397   :  { %v663_v58 = vsel %vm341_vm2, %v662_v55, %v656_v57 }
 0x3a3   :  { %v660_v59 = vpop.permute.xlu1 %659 }
 0x3a4   :  { %v665_v60 = vsel %vm664_vm9, %v663_v58, %v660_v59 }
 0x3a5   :  { %903 = vmatmul.msk.f32.vlgmr.msra.gmra.mxu2 %vm26_vm0, %v665_v60 }
 0x3ac   :  { %v784_v62 = vpop.permute.xlu0 %783 }
 0x3ad   :  { %v794_v6 = vsel %vm87_vm1, %v692_v5, %v784_v62 }
 0x3e8   :  { %v788_v63 = vpop.permute.xlu2 %787 }
 0x3e9   :  { %v795_v26 = vsel %vm341_vm2, %v794_v6, %v788_v63 }
 0x3f0   :  { %v792_v24 = vpop.permute.xlu1 %791 }
 0x3f1   :  { %v796_v7 = vsel %vm664_vm9, %v795_v26, %v792_v24 }
 0x3f2   :  { %904 = vmatmul.msk.f32.gmra.mxu2 %vm26_vm0, %v796_v7 }
 0x428   :  { %v839_v61 = vpop.f32.mrf.mxu2 }
 0x429   :  { %v840_v10 = vadd.f32 %v972_v9, %v839_v61 }
 0x42b   :  { %845 = vst.msk [vmem:[#allocation2] sm:$0xff] %vm26_vm0, %v840_v10 }
 0x475   :  { %v842_v11 = vpop.f32.mrf.mxu2 }
 0x476   :  { %v843_v12 = vadd.f32 %v972_v9, %v842_v11 }
 0x478   :  { %846 = vst.msk [vmem:[#allocation2 + $0x8] sm:$0xff] %vm26_vm0, %v843_v12 }
 0x479   :  { %859 = dma.vmem_to_hbm [thread:$0]  %s852_s23, 256, %s854_s22, [#allocation3], %s1047_s24, %s1047_s24, %s1043_s15  }
 0x47a   :  { %1029 = dma.done.wait [#allocation3], 256  }
 0x47b   :  { %1030 = vsyncadd [#allocation3], 4294967040 }
 0x47c   :  { %864 = vsyncpa [#allocation3], 1 }

</bundles_post_ra>
